<compile_context>
chip_gen: v7x
topology: tpu7x:2x2x1
jax: 0.10.0
libtpu: 0.0.40
codegen_flags: <defaults>
</compile_context>

<pallas_src>
import jax
import jax.numpy as jnp
from jax.experimental import pallas as pl
from jax.experimental.pallas import tpu as pltpu


def _make_mnr_kernel(doc_tile: int, sd: int, d: int):
    """Kernel body: signed, seq-summed doc reduction into a resident block."""
    L = doc_tile * sd

    def kernel(sign_ref, d_ref, out_ref):
        # sign_ref : VMEM [1, 1, 1, L]          per-element signs (+1/-1/0), docs dtype
        # d_ref    : VMEM [1, doc_tile, Sd, D]  doc tile for (batch b, block o*n_inner+i)
        # out_ref  : VMEM [1, 1, 1, D] f32      per-(batch, outer) partial, resident over i
        @pl.when(pl.program_id(2) == 0)
        def _init():
            out_ref[...] = jnp.zeros_like(out_ref)

        # Flatten (doc_tile, Sd) -> L (layout-trivial when Sd % 8 == 0).
        d_flat = d_ref[...].reshape(L, d)
        s_row = sign_ref[...].reshape(1, L)
        # Fused seq-sum + signed doc combine: one MXU matvec, f32 accumulation.
        w = jnp.dot(s_row, d_flat, preferred_element_type=jnp.float32)   # [1, D]
        out_ref[...] += w[None, None]                                    # [1,1,1,D]

    return kernel


def _pick_doc_tile(n_docs: int, sd: int, d: int, itemsize: int,
                   budget_bytes: int = 12 * 1024 * 1024) -> int:
    """Largest doc count whose block is ~<=12 MiB (2 buffers + signs + out stay
    well under a 32 MiB scoped VMEM limit on v5e/v6e/v7x)."""
    per_doc = max(1, sd * d * itemsize)
    return max(1, min(n_docs, budget_bytes // per_doc))


def _pick_outer_split(batch: int, n_blocks: int) -> int:
    """Guarantee >=2 (ideally even) parallel grid units for megacore sharding."""
    if batch >= 2 and batch % 2 == 0:
        return 1
    if n_blocks >= 2 and n_blocks % 2 == 0:
        return 2
    return 1


def multiple_negatives_ranking_loss(questions, docs, is_ans, *, doc_tile=None):
    """questions: [B, Sq, D]; docs: [B, N, Sd, D] (f32 or bf16); is_ans: [B, N] bool."""
    B, Sq, D = questions.shape
    Bd, N, Sd, Dd = docs.shape
    assert (Bd, Dd) == (B, D), "questions / docs shape mismatch"
    assert is_ans.shape == (B, N)
    # For best DMA/store efficiency D should be a multiple of 128 and Sd a
    # multiple of 8 (f32) / 16 (bf16); smaller shapes still run correctly.

    itemsize = jnp.dtype(docs.dtype).itemsize
    if doc_tile is None:
        doc_tile = _pick_doc_tile(N, Sd, D, itemsize)
    doc_tile = int(min(doc_tile, N))

    n_blocks = (N + doc_tile - 1) // doc_tile
    n_outer = _pick_outer_split(B, n_blocks)
    n_inner = n_blocks // n_outer
    assert n_outer * n_inner == n_blocks
    n_pad = n_blocks * doc_tile

    signs = jnp.where(is_ans, jnp.float32(-1.0), jnp.float32(1.0))       # [B, N]
    if n_pad != N:
        # Exact: zero-padded docs / zero signs contribute nothing.
        # TODO(synk): index-map clamp instead of a pad copy for awkward N.
        docs = jnp.pad(docs, ((0, 0), (0, n_pad - N), (0, 0), (0, 0)))
        signs = jnp.pad(signs, ((0, 0), (0, n_pad - N)))

    L = doc_tile * Sd
    sign_rows = jnp.broadcast_to(signs[:, :, None], (B, n_pad, Sd))
    sign_rows = sign_rows.reshape(B, n_blocks, 1, L).astype(docs.dtype)

    grid_spec = pltpu.PrefetchScalarGridSpec(
        num_scalar_prefetch=0,
        grid=(B, n_outer, n_inner),          # reduction (inner doc-tile) axis last
        in_specs=[
            pl.BlockSpec((1, 1, 1, L),
                         lambda b, o, i: (b, o * n_inner + i, 0, 0)),
            pl.BlockSpec((1, doc_tile, Sd, D),
                         lambda b, o, i: (b, o * n_inner + i, 0, 0)),
        ],
        out_specs=pl.BlockSpec((1, 1, 1, D), lambda b, o, i: (b, o, 0, 0)),
    )

    partials = pl.pallas_call(
        _make_mnr_kernel(doc_tile, Sd, D),
        out_shape=jax.ShapeDtypeStruct((B, n_outer, 1, D), jnp.float32),
        grid_spec=grid_spec,
        compiler_params=pltpu.CompilerParams(
            dimension_semantics=("parallel", "parallel", "arbitrary"),
            vmem_limit_bytes=32 * 1024 * 1024,
        ),
    )(sign_rows, docs)

    # Tiny wrapper-side epilogue: finish the per-batch dot and reduce.
    w = jnp.sum(partials, axis=(1, 2))                                   # [B, D]
    q_sum = jnp.sum(questions.astype(jnp.float32), axis=1)               # [B, D]
    return jnp.sum(q_sum * w) * (1.0 / float(Sq * Sd))


def _reference_loss(questions, docs, is_ans):
    # Pure-JAX reference mirroring the PyTorch double loop.
    q_mean = jnp.mean(questions.astype(jnp.float32), axis=1)             # [B, D]
    d_mean = jnp.mean(docs.astype(jnp.float32), axis=2)                  # [B, N, D]
    sims = jnp.einsum("bd,bnd->bn", q_mean, d_mean)                      # [B, N]
    signs = jnp.where(is_ans, -1.0, 1.0)
    return jnp.sum(sims * signs)


if __name__ == "__main__":
    key = jax.random.PRNGKey(0)
    kq, kd, ka = jax.random.split(key, 3)

    # Small but lane/sublane-friendly shapes: D multiple of 128, Sd multiple of 16.
    B, N, Sq, Sd, D = 2, 5, 8, 16, 128
    questions = jax.random.normal(kq, (B, Sq, D), dtype=jnp.float32)
    docs = jax.random.normal(kd, (B, N, Sd, D), dtype=jnp.float32)
    is_ans = (jax.random.randint(ka, (B, N), 0, N) == 0)

    ref = _reference_loss(questions, docs, is_ans)

    # 1) auto doc_tile (single tile per batch row).
    loss = multiple_negatives_ranking_loss(questions, docs, is_ans)
    jax.block_until_ready(loss)
    assert jnp.allclose(loss, ref, atol=1e-3, rtol=1e-4), (loss, ref)

    # 2) forced small tile: exercises tail padding (N=5 -> 6) + cross-tile accumulation.
    loss2 = multiple_negatives_ranking_loss(questions, docs, is_ans, doc_tile=2)
    jax.block_until_ready(loss2)
    assert jnp.allclose(loss2, ref, atol=1e-3, rtol=1e-4), (loss2, ref)

    # 3) bf16 doc streaming (half HBM bytes), f32 accumulation in the kernel.
    loss3 = multiple_negatives_ranking_loss(
        questions, docs.astype(jnp.bfloat16), is_ans, doc_tile=2)
    jax.block_until_ready(loss3)
    assert jnp.allclose(loss3, ref, atol=2e-1, rtol=2e-2), (loss3, ref)

    # 4) B=1: exercises the outer (megacore) split of the doc-tile axis.
    q1, d1, a1 = questions[:1], docs[:1, :4], is_ans[:1, :4]
    ref1 = _reference_loss(q1, d1, a1)
    loss4 = multiple_negatives_ranking_loss(q1, d1, a1, doc_tile=1)
    jax.block_until_ready(loss4)
    assert jnp.allclose(loss4, ref1, atol=1e-3, rtol=1e-4), (loss4, ref1)

    print("KERNEL_OK")
</pallas_src>

<mosaic_0001>
module attributes {stable_mosaic.version = 11 : i64} {
  func.func @kernel(%arg0: i32, %arg1: i32, %arg2: i32, %arg3: memref<1x1x1x80xf32, #tpu.memory_space<vmem>>, %arg4: memref<1x5x16x128xf32, #tpu.memory_space<vmem>>, %arg5: memref<1x1x1x128xf32, #tpu.memory_space<vmem>>) attributes {dimension_semantics = [#tpu.dimension_semantics<parallel>, #tpu.dimension_semantics<parallel>, #tpu.dimension_semantics<arbitrary>], iteration_bounds = array<i64: 2, 1, 1>, scalar_prefetch = 0 : i64, scratch_operands = 0 : i64, tpu.core_type = #tpu.core_type<tc>, window_params = [{transform_indices = @transform_0, window_bounds = array<i64: 1, 1, 1, 80>}, {transform_indices = @transform_1, window_bounds = array<i64: 1, 5, 16, 128>}, {transform_indices = @transform_2, window_bounds = array<i64: 1, 1, 1, 128>}]} {
    %c0_i32 = arith.constant 0 : i32
    %0 = arith.cmpi eq, %arg2, %c0_i32 : i32
    %1 = arith.extui %0 : i1 to i32
    %c0_i32_0 = arith.constant 0 : i32
    %2 = arith.cmpi ne, %1, %c0_i32_0 : i32
    scf.if %2 {
      %cst_16 = arith.constant 0.000000e+00 : f32
      %12 = vector.broadcast %cst_16 : f32 to vector<1x1x1x128xf32>
      %c0_17 = arith.constant 0 : index
      %c0_18 = arith.constant 0 : index
      %c0_19 = arith.constant 0 : index
      %c0_20 = arith.constant 0 : index
      %13 = vector.load %arg5[%c0_17, %c0_18, %c0_19, %c0_20] : memref<1x1x1x128xf32, #tpu.memory_space<vmem>>, vector<1x1x1x128xf32>
      tpu.vector_store %arg5[%c0_17, %c0_18, %c0_19, %c0_20], %12 {strides = array<i32>} : memref<1x1x1x128xf32, #tpu.memory_space<vmem>>, vector<1x1x1x128xf32>,
    } else {
    }
    %c0 = arith.constant 0 : index
    %c0_1 = arith.constant 0 : index
    %c0_2 = arith.constant 0 : index
    %c0_3 = arith.constant 0 : index
    %3 = vector.load %arg4[%c0, %c0_1, %c0_2, %c0_3] : memref<1x5x16x128xf32, #tpu.memory_space<vmem>>, vector<1x5x16x128xf32>
    %4 = vector.shape_cast %3 : vector<1x5x16x128xf32> to vector<80x128xf32>
    %c0_4 = arith.constant 0 : index
    %c0_5 = arith.constant 0 : index
    %c0_6 = arith.constant 0 : index
    %c0_7 = arith.constant 0 : index
    %5 = vector.load %arg3[%c0_4, %c0_5, %c0_6, %c0_7] : memref<1x1x1x80xf32, #tpu.memory_space<vmem>>, vector<1x1x1x80xf32>
    %6 = vector.shape_cast %5 : vector<1x1x1x80xf32> to vector<1x80xf32>
    %cst = arith.constant dense<0.000000e+00> : vector<1x128xf32>
    %7 = tpu.matmul %6, %4, %cst {dimension_numbers = #tpu.dot_dimension_numbers<[1], [0], [0], [1], [0, 0, 1, 1], [], []>} : vector<1x80xf32>, vector<80x128xf32>, vector<1x128xf32> -> vector<1x128xf32>
    %c0_8 = arith.constant 0 : index
    %c0_9 = arith.constant 0 : index
    %c0_10 = arith.constant 0 : index
    %c0_11 = arith.constant 0 : index
    %8 = vector.load %arg5[%c0_8, %c0_9, %c0_10, %c0_11] : memref<1x1x1x128xf32, #tpu.memory_space<vmem>>, vector<1x1x1x128xf32>
    %9 = vector.shape_cast %7 : vector<1x128xf32> to vector<1x1x1x128xf32>
    %10 = arith.addf %8, %9 : vector<1x1x1x128xf32>
    %c0_12 = arith.constant 0 : index
    %c0_13 = arith.constant 0 : index
    %c0_14 = arith.constant 0 : index
    %c0_15 = arith.constant 0 : index
    %11 = vector.load %arg5[%c0_12, %c0_13, %c0_14, %c0_15] : memref<1x1x1x128xf32, #tpu.memory_space<vmem>>, vector<1x1x1x128xf32>
    tpu.vector_store %arg5[%c0_12, %c0_13, %c0_14, %c0_15], %10 {strides = array<i32>} : memref<1x1x1x128xf32, #tpu.memory_space<vmem>>, vector<1x1x1x128xf32>,
    return
  }
  func.func @transform_0(%arg0: i32, %arg1: i32, %arg2: i32) -> (i32, i32, i32, i32) {
    %c1_i32 = arith.constant 1 : i32
    %0 = arith.muli %arg1, %c1_i32 : i32
    %1 = arith.addi %0, %arg2 : i32
    %c0_i32 = arith.constant 0 : i32
    %c0_i32_0 = arith.constant 0 : i32
    %c0_i32_1 = arith.constant 0 : i32
    return %arg0, %1, %c0_i32, %c0_i32_0 : i32, i32, i32, i32
  }
  func.func @transform_1(%arg0: i32, %arg1: i32, %arg2: i32) -> (i32, i32, i32, i32) {
    %c1_i32 = arith.constant 1 : i32
    %0 = arith.muli %arg1, %c1_i32 : i32
    %1 = arith.addi %0, %arg2 : i32
    %c0_i32 = arith.constant 0 : i32
    %c0_i32_0 = arith.constant 0 : i32
    %c0_i32_1 = arith.constant 0 : i32
    return %arg0, %1, %c0_i32, %c0_i32_0 : i32, i32, i32, i32
  }
  func.func @transform_2(%arg0: i32, %arg1: i32, %arg2: i32) -> (i32, i32, i32, i32) {
    %c0_i32 = arith.constant 0 : i32
    %c0_i32_0 = arith.constant 0 : i32
    %c0_i32_1 = arith.constant 0 : i32
    return %arg0, %arg1, %c0_i32, %c0_i32_0 : i32, i32, i32, i32
  }
}

</mosaic_0001>

<bundles_post_ra>
// kernel: tpu_custom_call.1
= control target key start
LH: loop header
LB: loop body
LE: loop exit
PB: predicated region body
PF: predicated region fallthrough
CT: control target
= control target key end

     0   :  { %7 = vsyncpa [#allocation3], 0  ;;  %s984_s0 = inlined_call_operand.hbm [shape: f32[2,1,1,80], index: 0, kind: input, shape index: {}]   ;;  %s985_s1 = inlined_call_operand.hbm [shape: f32[2,5,16,128], index: 1, kind: input, shape index: {}]   ;;  %s986_s2 = inlined_call_operand.hbm [shape: f32[2,1,1,128], index: 2, kind: output, shape index: {}]  }
   0x1   :  { %9 = vsyncpa [#allocation3 + $0x1], 0 }
   0x2   :  { %10 = vsyncpa [#allocation6], 0 }
   0x3   :  { %12 = vsyncpa [#allocation6 + $0x1], 0 }
   0x4   :  { %13 = vsyncpa [#allocation4], 0 }
   0x5   :  { %15 = vsyncpa [#allocation4 + $0x1], 0  ;;  %s750_s9 = smov 0   ;;  %s752_s10 = smov 0  }
   0x6   :  { %s754_s11 = smov 0   ;;  %s756_s12 = smov 0  }
   0x7   :  { %s758_s13 = smov 0   ;;  %s760_s14 = smov 0  }
   0x8 LB: > { %s444_s15 = sadd.s32 4294967295, %s725_s14   ;;  %s445_s16 = sadd.s32 4294967294, %s725_s14   ;;  %s725_s14 = sphi %s760_s14, %s21_s14   ;;  %s721_s13 = sphi %s758_s13, %s1005_s13   ;;  %s717_s12 = sphi %s756_s12, %s1004_s12   ;;  %s713_s11 = sphi %s754_s11, %s1003_s11   ;;  %s709_s10 = sphi %s752_s10, %s1002_s10   ;;  %s705_s9 = sphi %s750_s9, %s1001_s9  }
   0x9   : > { %s40_s17 = sadd.s32 1, %s721_s13  ;;  %s51_s18 = sadd.s32 1, %s713_s11 }
   0xa   : > { %p42_p0 = scmp.ge.s32.totalorder %s40_s17, 2  ;;  %p58_p1 = scmp.ne.s32.totalorder %s713_s11, %s709_s10 }
   0xb   : > { %p59_p2 = scmp.eq.s32.totalorder %s725_s14, 0  ;;  %p64_p3 = scmp.ne.s32.totalorder %s709_s10, %s705_s9 }
   0xc   : > { %s1007_s17 = smov (%p42_p0, %s40_s17), 0  ;;  %p65_p5 = scmp.eq.s32.totalorder %s444_s15, 0 }
   0xd   : > { %p791_p4 = por %p59_p2, %p58_p1  ;;  %s46_s20 = ssub.s32 %s721_s13, %s1007_s17 }
   0xe   : > { %p120_p6 = scmp.eq.s32.totalorder %s444_s15, 1  ;;  %p49_p7 = scmp.eq.s32.totalorder %s46_s20, 0 }
   0xf   : > { %p797_p8 = por %p65_p5, %p64_p3  ;;  %p126_p10 = scmp.eq.s32.totalorder %s445_s16, 1 }
  0x10   : > { %p801_p9 = por %p120_p6, %p58_p1  ;;  %p524_p13 = scmp.lt.s32.totalorder %s725_s14, 2 }
  0x11   : > { %s990_s21 = scalar_select %p797_p8, 1, 0 }
  0x12   : > { %s991_s22 = scalar_select %p801_p9, 1, 0 }
  0x13   : > { %s806_s23 = scalar_select %p49_p7, %s713_s11, %s51_s18  }
  0x14   : > { %p808_p11 = por %p126_p10, %p64_p3  ;;  %s815_s25 = sand.u32 1, %s713_s11  }
  0x15   : > { %s448_s26 = sshll.u32 %s721_s13, 4  ;;  %s149_s27 = scalar_lea.vmem [#allocation2], %s815_s25 }
  0x16   : > { %s992_s24 = scalar_select %p808_p11, 1, 0 }
  0x17   : > { %s158_s28 = sshll.u32 %s149_s27, 4  ;;  %s822_s3 = scalar_lea.hbm %s984_s0, %s448_s26  ;;  %s824_s28 = int_to_ptr.vmem [resolvable:$true] %s158_s28 }
  0x18   : > { %p828_p0 = pnand %p524_p13, %p791_p4  ;;  %s504_s5 = smul.u32 80, %s815_s25 }
  0x19   : > { %s147_s6 = scalar_lea.sflag [#allocation3], %s815_s25  ;;  %s579_s7 = scalar_lea.hbm %s822_s3, 16 }
  0x1a   : > { %p580_p3 = scmp.ne.s32.totalorder %s822_s3, %s579_s7  ;;  %p581_p5 = pneg %p828_p0 }
  0x1b   : > { %s584_s16 = scalar_lea.hbm %s984_s0, 32  ;;  %p585_p4 = scmp.lt.u32.totalorder %s822_s3, %s984_s0 }
  0x1c   : > { %p582_p6 = pnand %p581_p5, %p580_p3  ;;  %p586_p10 = scmp.lt.u32.totalorder %s584_s16, %s579_s7 }
  0x1d   : > { %p588_p12 = scmp.lt.u32.totalorder %s579_s7, %s822_s3 }
  0x1e   : > { %p583_p7 = pneg %p582_p6  ;;  %p587_p13 = por %p586_p10, %p585_p4 }
  0x20   : > { %p589_p1 = por %p588_p12, %p587_p13 }
  0x22   : > { %p590_p2 = pnand %p589_p1, %p583_p7 }
  0x24   : > { %593 = shalt.err (!%p590_p2)
}
  0x25   : > { %s594_s20 = scalar_lea.vmem %s824_s28, 16  ;;  %s727_s26 = smov [#allocation2]  }
  0x26   : > { %p595_p3 = scmp.ne.s32.totalorder %s824_s28, %s594_s20  ;;  %s599_s27 = sshll.u32 %s727_s26, 4  ;;  %s600_s27 = int_to_ptr.vmem [resolvable:$false] %s599_s27 }
  0x27   : > { %s601_s29 = scalar_lea.vmem %s600_s27, 32  ;;  %p602_p9 = scmp.lt.s32.totalorder %s824_s28, %s600_s27 }
  0x28   : > { %p597_p6 = pnand %p595_p3, %p581_p5  ;;  %p603_p4 = scmp.lt.s32.totalorder %s601_s29, %s594_s20 }
  0x2a   : > { %p598_p11 = pneg %p597_p6  ;;  %p604_p10 = por %p603_p4, %p602_p9 }
  0x2c   : > { %p605_p12 = pnand %p604_p10, %p598_p11 }
  0x2e   : > { %608 = shalt.err (!%p605_p12)
}
  0x2f   : > { %516 = dma.hbm_to_vmem [thread:$0]  (!%p828_p0), %s822_s3, 16, %s824_s28, %s147_s6  }
  0x30   : > { %p994_p1 = scmp.lt.s32.totalorder %s725_s14, 3  ;;  %p995_p2 = scmp.ge.s32.totalorder %s725_s14, 1 }
  0x31   : > { %s505_s7 = smul.u32 1280, %s721_s13  ;;  %s169_s8 = scalar_lea.vmem [#allocation5], %s504_s5 }
  0x32   : > { %p865_p7 = pnand %p995_p2, %p994_p1  ;;  %s180_s15 = sshll.u32 %s169_s8, 4  ;;  %s872_s15 = int_to_ptr.vmem [resolvable:$true] %s180_s15 }
  0x33   : > { %s877_s19 = scalar_lea.hbm %s985_s1, %s505_s7  ;;  %s166_s28 = scalar_lea.sflag [#allocation6], %s815_s25 }
  0x34   : > { %s609_s3 = scalar_lea.hbm %s877_s19, 1280  ;;  %s614_s20 = scalar_lea.hbm %s985_s1, 2560 }
  0x35   : > { %p610_p9 = scmp.ne.s32.totalorder %s877_s19, %s609_s3  ;;  %p615_p3 = scmp.lt.u32.totalorder %s877_s19, %s985_s1 }
  0x36   : > { %p616_p6 = scmp.lt.u32.totalorder %s614_s20, %s609_s3  ;;  %p618_p10 = scmp.lt.u32.totalorder %s609_s3, %s877_s19 }
  0x37   : > { %p612_p11 = pnand %p610_p9, %p581_p5 }
  0x38   : > { %p617_p4 = por %p616_p6, %p615_p3 }
  0x39   : > { %p613_p13 = pneg %p612_p11 }
  0x3a   : > { %p619_p12 = por %p618_p10, %p617_p4 }
  0x3c   : > { %p620_p1 = pnand %p619_p12, %p613_p13 }
  0x3e   : > { %623 = shalt.err (!%p620_p1)
}
  0x3f   : > { %s624_s29 = scalar_lea.vmem %s872_s15, 1280  ;;  %s728_s7 = smov [#allocation5]  }
  0x40   : > { %p625_p2 = scmp.ne.s32.totalorder %s872_s15, %s624_s29  ;;  %s629_s8 = sshll.u32 %s728_s7, 4  ;;  %s630_s8 = int_to_ptr.vmem [resolvable:$false] %s629_s8 }
  0x41   : > { %s631_s16 = scalar_lea.vmem %s630_s8, 2560  ;;  %p632_p8 = scmp.lt.s32.totalorder %s872_s15, %s630_s8 }
  0x42   : > { %p627_p9 = pnand %p625_p2, %p581_p5  ;;  %p633_p3 = scmp.lt.s32.totalorder %s631_s16, %s624_s29 }
  0x44   : > { %p628_p11 = pneg %p627_p9  ;;  %p634_p6 = por %p633_p3, %p632_p8 }
  0x46   : > { %p635_p4 = pnand %p634_p6, %p628_p11 }
  0x48   : > { %638 = shalt.err (!%p635_p4)
}
  0x49   : > { %s729_s18 = smov 128   ;;  %s730_s3 = smov 8  }
  0x4a   : > { %519 = dma.hbm_to_vmem [thread:$0]  (!%p828_p0), %s877_s19, 1280, %s872_s15, %s166_s28, %s729_s18, %s729_s18, %s730_s3  }
  0x4b   : > { %192 = sbr.rel (%p865_p7) target bundleno = 338 (0x152), region = 28  ;;  %s908_s5 = sand.u32 (!%p865_p7), 1, %s709_s10  }
  0x4c   : > { %s195_s6 = scalar_lea.sflag (!%p865_p7), [#allocation3], %s908_s5  ;;  %s197_s20 = scalar_lea.vmem (!%p865_p7), [#allocation2], %s908_s5 }
  0x4d   : > { %p997_p8 = scmp.ne.s32.totalorder (!%p865_p7), %s990_s21, 0 }
  0x52   : > { %692 = dma.done.wait (%p997_p8), %s195_s6, 16  }
  0x53   : > { %694 = vsyncadd (%p997_p8), %s195_s6, 4294967280  ;;  %s506_s25 = smul.u32 80, %s908_s5  ;;  %s203_s4 = scalar_lea.sflag [#allocation6], %s908_s5 }
  0x55   : > { %s206_s30 = scalar_lea.vmem [#allocation5], %s506_s25 }
  0x56   : > { %696 = dma.done.wait (%p997_p8), %s203_s4, 1280  }
  0x57   : > { %698 = vsyncadd (%p997_p8), %s203_s4, 4294966016  ;;  %v731_v0 = vmov 0.0|0.0   ;;  %s923_s15 = scalar_lea.vmem [#allocation7], %s908_s5  ;;  %v732_v1 = vmov 0.0   ;;  %vm733_vm0 = vmmov 0   ;;  %v238_v2 = vld [vmem:[%s206_s30] sm:$0xff] }
  0x58   : > { %489 = vmatprep.subr.bf16.mxu0 %v731_v0  ;;  %237 = vst [vmem:[%s923_s15] sm:$0x1] %v732_v1  ;;  %486 = vmatprep.mubr.msk.f32.mxu0 %vm733_vm0, %v732_v1  ;;  %v239_v3 = vld [vmem:[%s206_s30 + $0x8] sm:$0xff]  ;;  %v240_v4 = vld [vmem:[%s206_s30 + $0x10] sm:$0xff]  ;;  %v241_v6 = vld [vmem:[%s206_s30 + $0x18] sm:$0xff]  ;;  %vm249_vm1 = vcmask 654336   ;;  %s452_s21 = sshll.u32 %s717_s12, 4 }
  0x59   : > { %v490_v5 = vpack.c.bf16 %v239_v3, %v238_v2  ;;  %v493_v7 = vpack.c.bf16 %v241_v6, %v240_v4  ;;  %v242_v8 = vld [vmem:[%s206_s30 + $0x20] sm:$0xff]  ;;  %v243_v9 = vld [vmem:[%s206_s30 + $0x28] sm:$0xff]  ;;  %v244_v11 = vld [vmem:[%s206_s30 + $0x30] sm:$0xff]  ;;  %s340_s19 = sshll.u32 %s923_s15, 4  ;;  %s934_s27 = scalar_lea.hbm %s986_s2, %s452_s21  ;;  %s936_s19 = int_to_ptr.vmem [resolvable:$true] %s340_s19 }
  0x5a   : > { %v496_v10 = vpack.c.bf16 %v243_v9, %v242_v8  ;;  %v245_v12 = vld [vmem:[%s206_s30 + $0x38] sm:$0xff]  ;;  %v246_v14 = vld [vmem:[%s206_s30 + $0x40] sm:$0xff]  ;;  %v247_v15 = vld [vmem:[%s206_s30 + $0x48] sm:$0xff]  ;;  %s327_s29 = scalar_lea.sflag [#allocation4], %s908_s5  ;;  %s639_s7 = scalar_lea.vmem %s936_s19, 16 }
  0x5b   : > { %491 = vmatpush3.bf16.msra.mxu0 %v490_v5  ;;  %v499_v13 = vpack.c.bf16 %v245_v12, %v244_v11  ;;  %v502_v16 = vpack.c.bf16 %v247_v15, %v246_v14  ;;  %v248_v17 = vld [vmem:[%s197_s20] sm:$0x1]  ;;  %p640_p0 = scmp.ne.s32.totalorder %s936_s19, %s639_s7  ;;  %p998_p5 = scmp.ne.s32.totalorder %s991_s22, 0 }
  0x5c   : > { %492 = vmatprep.subr.bf16.mxu0 %v731_v0  ;;  %s734_s12 = smov [#allocation7]  }
  0x5d   : > { %p641_p7 = pnand %p640_p0, %p998_p5  ;;  %s643_s8 = sshll.u32 %s734_s12, 4  ;;  %s644_s8 = int_to_ptr.vmem [resolvable:$false] %s643_s8 }
  0x5e   : > { %s645_s16 = scalar_lea.vmem %s644_s8, 32  ;;  %p646_p10 = scmp.lt.s32.totalorder %s936_s19, %s644_s8 }
  0x5f   : > { %494 = vmatpush3.bf16.msra.mxu0 %v493_v7  ;;  %v323_v18 = vld [vmem:[%s923_s15] sm:$0x1]  ;;  %p642_p13 = pneg %p641_p7  ;;  %p647_p12 = scmp.lt.s32.totalorder %s645_s16, %s639_s7 }
  0x60   : > { %495 = vmatprep.subr.bf16.mxu0 %v731_v0 }
  0x61   : > { %p648_p1 = por %p647_p12, %p646_p10 }
  0x63   : > { %497 = vmatpush3.bf16.msra.mxu0 %v496_v10  ;;  %p649_p2 = pnand %p648_p1, %p642_p13 }
  0x64   : > { %498 = vmatprep.subr.bf16.mxu0 %v731_v0 }
  0x67   : > { %500 = vmatpush3.bf16.msra.mxu0 %v499_v13 }
  0x68   : > { %501 = vmatprep.subr.bf16.mxu0 %v731_v0 }
  0x6b   : > { %503 = vmatpush3.bf16.msra.mxu0 %v502_v16 }
  0x6e   : > { %487 = vmatmul.mubr.msk.f32.vlgmr.msra.gmra.mrb[0].mxu0 %vm249_vm1, %v248_v17 }
 0x141   : > { %v319_v19 = vpop.f32.mrb[0].mxu0 }
 0x142   : > { %v324_v20 = vadd.f32 %v323_v18, %v319_v19  ;;  %v488_v21 = vpop.f32.mrb[1].mxu0 }
 0x144   : > { %325 = vst [vmem:[%s923_s15] sm:$0x1] %v324_v20 }
 0x145   : > { %652 = shalt.err (!%p649_p2)
}
 0x146   : > { %s653_s18 = scalar_lea.hbm %s934_s27, 16  ;;  %s657_s6 = scalar_lea.hbm %s986_s2, 32 }
 0x147   : > { %p654_p9 = scmp.ne.s32.totalorder %s934_s27, %s653_s18  ;;  %p658_p6 = scmp.lt.u32.totalorder %s934_s27, %s986_s2 }
 0x148   : > { %p659_p4 = scmp.lt.u32.totalorder %s657_s6, %s653_s18  ;;  %p661_p0 = scmp.lt.u32.totalorder %s653_s18, %s934_s27 }
 0x149   : > { %p655_p11 = pnand %p654_p9, %p998_p5 }
 0x14a   : > { %p660_p8 = por %p659_p4, %p658_p6 }
 0x14b   : > { %p656_p3 = pneg %p655_p11 }
 0x14c   : > { %p662_p7 = por %p661_p0, %p660_p8 }
 0x14e   : > { %p663_p13 = pnand %p662_p7, %p656_p3 }
 0x150   : > { %666 = shalt.err (!%p663_p13)
}
 0x151   : > { %511 = dma.vmem_to_hbm [thread:$0]  (%p998_p5), %s936_s19, 16, %s934_s27, %s327_s29  }
 0x152 PF: > { %s352_s4 = sand.u32 1, %s705_s9   ;;  %p999_p10 = scmp.ne.s32.totalorder %s992_s24, 0 }
 0x153   : > { %p1000_p12 = scmp.ge.s32.totalorder %s725_s14, 2  ;;  %s353_s30 = scalar_lea.sflag [#allocation4], %s352_s4 }
 0x155   : > { %p521_p1 = pnand %p1000_p12, %p999_p10 }
 0x157   : > { %700 = dma.done.wait (!%p521_p1), %s353_s30, 16  }
 0x158   : > { %702 = vsyncadd (!%p521_p1), %s353_s30, 4294967280  ;;  %s21_s14 = sadd.s32 1, %s725_s14   ;;  %s1001_s9 = smov %s709_s10 }
 0x159   : > { %p18_p2 = scmp.ge.s32.totalorder %s21_s14, 4   ;;  %s1002_s10 = smov %s713_s11 }
 0x15a   : > { %s1003_s11 = smov %s806_s23  ;;  %s1004_s12 = smov %s721_s13 }
 0x15b   : > { %s1005_s13 = smov %s1007_s17  ;;  %20 = sbr.rel (!%p18_p2) target bundleno = 8 (0x8), region = 90 }
 0x162   :  { %357 = vsyncpa [#allocation3], 1 }
 0x163   :  { %359 = vsyncpa [#allocation3 + $0x1], 1 }
 0x164   :  { %360 = vsyncpa [#allocation6], 1 }
 0x165   :  { %362 = vsyncpa [#allocation6 + $0x1], 1 }
 0x166   :  { %363 = vsyncpa [#allocation4], 1 }
 0x167   :  { %365 = vsyncpa [#allocation4 + $0x1], 1 }

</bundles_post_ra>
